<compile_context>
chip_gen: v5e
topology: v5e:2x2
jax: 0.10.0
libtpu: 0.0.40
codegen_flags: <defaults>
</compile_context>

<pallas_src>
import math
import functools

import jax
import jax.numpy as jnp
from jax import lax
from jax.experimental import pallas as pl
from jax.experimental.pallas import tpu as pltpu


def _transformer_block_kernel(x_ref, wqkv_ref, bqkv_ref, wo_ref, bo_ref,
                              out_ref, attn_ref, *, num_heads, d_k,
                              compute_dtype):
    D = num_heads * d_k
    x = x_ref[0].astype(compute_dtype)                          # (S, D)

    # One wide fused QKV projection: (S, D) x (D, 3D) -> (S, 3D), f32 accum.
    # The 1/sqrt(d_k) attention scale is pre-folded into the Q columns/bias.
    qkv = jnp.dot(x, wqkv_ref[...],
                  preferred_element_type=jnp.float32) + bqkv_ref[...]

    # Statically unrolled loop over heads (H is a trace-time constant), so all
    # slices are static and there is no cross-grid-iteration state.
    head_outs = []
    for h in range(num_heads):
        q = qkv[:, h * d_k:(h + 1) * d_k]                        # (S, d_k)
        k = qkv[:, D + h * d_k:D + (h + 1) * d_k]                # (S, d_k)
        v = qkv[:, 2 * D + h * d_k:2 * D + (h + 1) * d_k]        # (S, d_k)

        # scores = q @ k^T (scale already folded into W_q); no on-chip
        # transpose thanks to dot_general contracting dims.
        scores = lax.dot_general(
            q.astype(compute_dtype), k.astype(compute_dtype),
            dimension_numbers=(((1,), (1,)), ((), ())),
            preferred_element_type=jnp.float32)                  # (S, S)

        # Numerically-stable, *exact* softmax in f32 (matches PyTorch; the
        # previous approx-reciprocal denominator was a correctness concern).
        scores = scores - jnp.max(scores, axis=-1, keepdims=True)
        p = jnp.exp(scores)
        probs = p / jnp.sum(p, axis=-1, keepdims=True)

        attn_ref[0, h] = probs.astype(attn_ref.dtype)

        head_outs.append(
            jnp.dot(probs.astype(compute_dtype), v.astype(compute_dtype),
                    preferred_element_type=jnp.float32))         # (S, d_k)

    # Register-level head concat, then ONE wide (S,D)x(D,D) output projection
    # (better MXU fill than H narrow K=d_k matmuls).
    concat = jnp.concatenate(head_outs, axis=-1)                 # (S, D)
    out_ref[0] = (jnp.dot(concat.astype(compute_dtype), wo_ref[...],
                          preferred_element_type=jnp.float32)
                  + bo_ref[...]).astype(out_ref.dtype)


def pack_params(params, num_heads, compute_dtype=jnp.float32):
    """One-time HBM-side weight repack (hoist this out of the per-call path).

    params = (W_q, b_q, W_k, b_k, W_v, b_v, W_o, b_o) in PyTorch nn.Linear
    layout (W: (out, in), b: (out,)).  nn.Linear computes y = z @ W.T + b, so
    weights are pre-transposed here; the attention scale 1/sqrt(d_k) is folded
    into the Q projection (weights and bias) with identical math.
    """
    wq, bq, wk, bk, wv, bv, wo, bo = params
    D = wq.shape[0]
    d_k = D // num_heads
    scale = 1.0 / math.sqrt(d_k)

    w_qkv = jnp.concatenate([wq.T * scale, wk.T, wv.T], axis=1)      # (D, 3D)
    b_qkv = jnp.concatenate([bq * scale, bk, bv]).reshape(1, 3 * D)  # (1, 3D)
    w_o = wo.T                                                       # (D, D)
    b_o = bo.reshape(1, D)                                           # (1, D)

    return (w_qkv.astype(compute_dtype), b_qkv.astype(jnp.float32),
            w_o.astype(compute_dtype), b_o.astype(jnp.float32))


def simple_transformer_block(x, params, *, num_heads,
                             compute_dtype=jnp.float32, packed=None):
    """x: (B, S, D).  Returns (output (B,S,D), attn (B,H,S,S)).

    If `packed` (from pack_params with the same compute_dtype) is given, the
    per-call weight repack is skipped entirely.
    """
    B, S, D = x.shape
    assert D % num_heads == 0, "d_model must be divisible by num_heads"
    d_k = D // num_heads
    if packed is None:
        packed = pack_params(params, num_heads, compute_dtype)
    w_qkv, b_qkv, w_o, b_o = packed

    kernel = functools.partial(_transformer_block_kernel,
                               num_heads=num_heads, d_k=d_k,
                               compute_dtype=compute_dtype)

    out, attn = pl.pallas_call(
        kernel,
        out_shape=(
            jax.ShapeDtypeStruct((B, S, D), x.dtype),
            jax.ShapeDtypeStruct((B, num_heads, S, S), x.dtype),
        ),
        grid_spec=pltpu.PrefetchScalarGridSpec(
            num_scalar_prefetch=0,
            grid=(B,),                                   # one step per batch
            in_specs=[
                pl.BlockSpec((1, S, D), lambda b: (b, 0, 0)),     # x
                # Constant index_maps: weights DMA'd once, VMEM-resident.
                pl.BlockSpec((D, 3 * D), lambda b: (0, 0)),       # packed W_qkv
                pl.BlockSpec((1, 3 * D), lambda b: (0, 0)),       # packed b_qkv
                pl.BlockSpec((D, D), lambda b: (0, 0)),           # W_o (pre-T)
                pl.BlockSpec((1, D), lambda b: (0, 0)),           # b_o
            ],
            out_specs=(
                pl.BlockSpec((1, S, D), lambda b: (b, 0, 0)),              # out
                pl.BlockSpec((1, num_heads, S, S), lambda b: (b, 0, 0, 0)),  # attn
            ),
        ),
        compiler_params=pltpu.CompilerParams(
            dimension_semantics=("parallel",)),          # megacore over batch
    )(x.astype(compute_dtype), w_qkv, b_qkv, w_o, b_o)
    return out, attn


def _reference(x, params, num_heads):
    """Pure-JAX reference matching the PyTorch forward exactly (mask=None)."""
    wq, bq, wk, bk, wv, bv, wo, bo = params
    B, S, D = x.shape
    d_k = D // num_heads
    hi = lax.Precision.HIGHEST

    def lin(z, w, b):
        return jnp.dot(z, w.T, precision=hi) + b

    def split_heads(z):
        return z.reshape(B, S, num_heads, d_k).transpose(0, 2, 1, 3)

    Q = split_heads(lin(x, wq, bq))
    K = split_heads(lin(x, wk, bk))
    V = split_heads(lin(x, wv, bv))
    scores = jnp.einsum("bhqd,bhkd->bhqk", Q, K, precision=hi) / math.sqrt(d_k)
    attn = jax.nn.softmax(scores, axis=-1)
    out = jnp.einsum("bhqk,bhkd->bhqd", attn, V, precision=hi)
    concat = out.transpose(0, 2, 1, 3).reshape(B, S, D)
    return lin(concat, wo, bo), attn


if __name__ == "__main__":
    B, S, D, H = 2, 8, 32, 4

    key = jax.random.PRNGKey(0)
    keys = jax.random.split(key, 9)
    w_scale = 1.0 / math.sqrt(D)

    x = jax.random.normal(keys[0], (B, S, D), dtype=jnp.float32)
    params = (
        jax.random.normal(keys[1], (D, D), dtype=jnp.float32) * w_scale,  # W_q
        jax.random.normal(keys[2], (D,), dtype=jnp.float32) * w_scale,    # b_q
        jax.random.normal(keys[3], (D, D), dtype=jnp.float32) * w_scale,  # W_k
        jax.random.normal(keys[4], (D,), dtype=jnp.float32) * w_scale,    # b_k
        jax.random.normal(keys[5], (D, D), dtype=jnp.float32) * w_scale,  # W_v
        jax.random.normal(keys[6], (D,), dtype=jnp.float32) * w_scale,    # b_v
        jax.random.normal(keys[7], (D, D), dtype=jnp.float32) * w_scale,  # fc_out W
        jax.random.normal(keys[8], (D,), dtype=jnp.float32) * w_scale,    # fc_out b
    )

    # Hoisted one-time weight repack (per perf review), reused across calls.
    packed_f32 = pack_params(params, num_heads=H, compute_dtype=jnp.float32)

    out, attn = simple_transformer_block(x, params, num_heads=H,
                                         compute_dtype=jnp.float32,
                                         packed=packed_f32)
    jax.block_until_ready((out, attn))

    ref_out, ref_attn = _reference(x, params, H)
    assert jnp.allclose(out, ref_out, atol=2e-3, rtol=2e-2), "output mismatch"
    assert jnp.allclose(attn, ref_attn, atol=2e-3, rtol=2e-2), "attn mismatch"

    # Production-oriented bf16-MXU path (f32 accumulation kept in-kernel);
    # loose sanity check only, since operands are rounded to bf16.
    out_bf, attn_bf = simple_transformer_block(x, params, num_heads=H,
                                               compute_dtype=jnp.bfloat16)
    jax.block_until_ready((out_bf, attn_bf))
    assert jnp.allclose(out_bf, ref_out, atol=1e-1, rtol=1e-1), "bf16 sanity"

    print("KERNEL_OK")
</pallas_src>

<mosaic_0001>
module attributes {stable_mosaic.version = 11 : i64} {
  func.func @_transformer_block_kernel(%arg0: i32, %arg1: memref<1x8x32xf32, #tpu.memory_space<vmem>>, %arg2: memref<32x96xf32, #tpu.memory_space<vmem>>, %arg3: memref<1x96xf32, #tpu.memory_space<vmem>>, %arg4: memref<32x32xf32, #tpu.memory_space<vmem>>, %arg5: memref<1x32xf32, #tpu.memory_space<vmem>>, %arg6: memref<1x8x32xf32, #tpu.memory_space<vmem>>, %arg7: memref<1x4x8x8xf32, #tpu.memory_space<vmem>>) attributes {dimension_semantics = [#tpu.dimension_semantics<parallel>], iteration_bounds = array<i64: 2>, scalar_prefetch = 0 : i64, scratch_operands = 0 : i64, tpu.core_type = #tpu.core_type<tc>, window_params = [{transform_indices = @transform_0, window_bounds = array<i64: 1, 8, 32>}, {pipeline_mode = #tpu.pipeline_mode<synchronous>, transform_indices = @transform_1, window_bounds = array<i64: 32, 96>}, {pipeline_mode = #tpu.pipeline_mode<synchronous>, transform_indices = @transform_2, window_bounds = array<i64: 1, 96>}, {pipeline_mode = #tpu.pipeline_mode<synchronous>, transform_indices = @transform_3, window_bounds = array<i64: 32, 32>}, {pipeline_mode = #tpu.pipeline_mode<synchronous>, transform_indices = @transform_4, window_bounds = array<i64: 1, 32>}, {transform_indices = @transform_5, window_bounds = array<i64: 1, 8, 32>}, {transform_indices = @transform_6, window_bounds = array<i64: 1, 4, 8, 8>}]} {
    %c0 = arith.constant 0 : index
    %c0_0 = arith.constant 0 : index
    %c0_1 = arith.constant 0 : index
    %0 = vector.load %arg1[%c0, %c0_0, %c0_1] : memref<1x8x32xf32, #tpu.memory_space<vmem>>, vector<1x8x32xf32>
    %1 = vector.shape_cast %0 : vector<1x8x32xf32> to vector<8x32xf32>
    %c0_2 = arith.constant 0 : index
    %c0_3 = arith.constant 0 : index
    %2 = vector.load %arg2[%c0_2, %c0_3] : memref<32x96xf32, #tpu.memory_space<vmem>>, vector<32x96xf32>
    %cst = arith.constant dense<0.000000e+00> : vector<8x96xf32>
    %3 = tpu.matmul %1, %2, %cst {dimension_numbers = #tpu.dot_dimension_numbers<[1], [0], [0], [1], [0, 0, 1, 1], [], []>} : vector<8x32xf32>, vector<32x96xf32>, vector<8x96xf32> -> vector<8x96xf32>
    %c0_4 = arith.constant 0 : index
    %c0_5 = arith.constant 0 : index
    %4 = vector.load %arg3[%c0_4, %c0_5] : memref<1x96xf32, #tpu.memory_space<vmem>>, vector<1x96xf32>
    %5 = vector.broadcast %4 : vector<1x96xf32> to vector<8x96xf32>
    %6 = arith.addf %3, %5 : vector<8x96xf32>
    %7 = vector.extract_strided_slice %6 {offsets = [0, 0], sizes = [8, 8], strides = [1, 1]} : vector<8x96xf32> to vector<8x8xf32>
    %8 = vector.extract_strided_slice %6 {offsets = [0, 32], sizes = [8, 8], strides = [1, 1]} : vector<8x96xf32> to vector<8x8xf32>
    %9 = vector.extract_strided_slice %6 {offsets = [0, 64], sizes = [8, 8], strides = [1, 1]} : vector<8x96xf32> to vector<8x8xf32>
    %cst_6 = arith.constant dense<0.000000e+00> : vector<8x8xf32>
    %10 = tpu.matmul %7, %8, %cst_6 {dimension_numbers = #tpu.dot_dimension_numbers<[1], [1], [0], [0], [0, 0, 1, 0], [], []>} : vector<8x8xf32>, vector<8x8xf32>, vector<8x8xf32> -> vector<8x8xf32>
    %cst_7 = arith.constant dense<0xFF800000> : vector<8xf32>
    %11 = vector.multi_reduction <maximumf>, %10, %cst_7 [1] : vector<8x8xf32> to vector<8xf32>
    %12 = vector.shape_cast %11 : vector<8xf32> to vector<8x1xf32>
    %13 = vector.broadcast %12 : vector<8x1xf32> to vector<8x8xf32>
    %14 = arith.subf %10, %13 : vector<8x8xf32>
    %15 = math.exp %14 : vector<8x8xf32>
    %cst_8 = arith.constant dense<0.000000e+00> : vector<8xf32>
    %16 = vector.multi_reduction <add>, %15, %cst_8 [1] : vector<8x8xf32> to vector<8xf32>
    %17 = vector.shape_cast %16 : vector<8xf32> to vector<8x1xf32>
    %18 = vector.broadcast %17 : vector<8x1xf32> to vector<8x8xf32>
    %19 = arith.divf %15, %18 : vector<8x8xf32>
    %c0_9 = arith.constant 0 : index
    %c0_10 = arith.constant 0 : index
    %c0_11 = arith.constant 0 : index
    %c0_12 = arith.constant 0 : index
    %20 = vector.load %arg7[%c0_9, %c0_10, %c0_11, %c0_12] : memref<1x4x8x8xf32, #tpu.memory_space<vmem>>, vector<1x1x8x8xf32>
    %21 = vector.shape_cast %20 : vector<1x1x8x8xf32> to vector<8x8xf32>
    %22 = vector.shape_cast %19 : vector<8x8xf32> to vector<1x1x8x8xf32>
    tpu.vector_store %arg7[%c0_9, %c0_10, %c0_11, %c0_12], %22 {strides = array<i32>} : memref<1x4x8x8xf32, #tpu.memory_space<vmem>>, vector<1x1x8x8xf32>,
    %cst_13 = arith.constant dense<0.000000e+00> : vector<8x8xf32>
    %23 = tpu.matmul %19, %9, %cst_13 {dimension_numbers = #tpu.dot_dimension_numbers<[1], [0], [0], [1], [0, 0, 1, 1], [], []>} : vector<8x8xf32>, vector<8x8xf32>, vector<8x8xf32> -> vector<8x8xf32>
    %24 = vector.extract_strided_slice %6 {offsets = [0, 8], sizes = [8, 8], strides = [1, 1]} : vector<8x96xf32> to vector<8x8xf32>
    %25 = vector.extract_strided_slice %6 {offsets = [0, 40], sizes = [8, 8], strides = [1, 1]} : vector<8x96xf32> to vector<8x8xf32>
    %26 = vector.extract_strided_slice %6 {offsets = [0, 72], sizes = [8, 8], strides = [1, 1]} : vector<8x96xf32> to vector<8x8xf32>
    %cst_14 = arith.constant dense<0.000000e+00> : vector<8x8xf32>
    %27 = tpu.matmul %24, %25, %cst_14 {dimension_numbers = #tpu.dot_dimension_numbers<[1], [1], [0], [0], [0, 0, 1, 0], [], []>} : vector<8x8xf32>, vector<8x8xf32>, vector<8x8xf32> -> vector<8x8xf32>
    %cst_15 = arith.constant dense<0xFF800000> : vector<8xf32>
    %28 = vector.multi_reduction <maximumf>, %27, %cst_15 [1] : vector<8x8xf32> to vector<8xf32>
    %29 = vector.shape_cast %28 : vector<8xf32> to vector<8x1xf32>
    %30 = vector.broadcast %29 : vector<8x1xf32> to vector<8x8xf32>
    %31 = arith.subf %27, %30 : vector<8x8xf32>
    %32 = math.exp %31 : vector<8x8xf32>
    %cst_16 = arith.constant dense<0.000000e+00> : vector<8xf32>
    %33 = vector.multi_reduction <add>, %32, %cst_16 [1] : vector<8x8xf32> to vector<8xf32>
    %34 = vector.shape_cast %33 : vector<8xf32> to vector<8x1xf32>
    %35 = vector.broadcast %34 : vector<8x1xf32> to vector<8x8xf32>
    %36 = arith.divf %32, %35 : vector<8x8xf32>
    %c0_17 = arith.constant 0 : index
    %c1 = arith.constant 1 : index
    %c0_18 = arith.constant 0 : index
    %c0_19 = arith.constant 0 : index
    %37 = vector.load %arg7[%c0_17, %c1, %c0_18, %c0_19] : memref<1x4x8x8xf32, #tpu.memory_space<vmem>>, vector<1x1x8x8xf32>
    %38 = vector.shape_cast %37 : vector<1x1x8x8xf32> to vector<8x8xf32>
    %39 = vector.shape_cast %36 : vector<8x8xf32> to vector<1x1x8x8xf32>
    tpu.vector_store %arg7[%c0_17, %c1, %c0_18, %c0_19], %39 {strides = array<i32>} : memref<1x4x8x8xf32, #tpu.memory_space<vmem>>, vector<1x1x8x8xf32>,
    %cst_20 = arith.constant dense<0.000000e+00> : vector<8x8xf32>
    %40 = tpu.matmul %36, %26, %cst_20 {dimension_numbers = #tpu.dot_dimension_numbers<[1], [0], [0], [1], [0, 0, 1, 1], [], []>} : vector<8x8xf32>, vector<8x8xf32>, vector<8x8xf32> -> vector<8x8xf32>
    %41 = vector.extract_strided_slice %6 {offsets = [0, 16], sizes = [8, 8], strides = [1, 1]} : vector<8x96xf32> to vector<8x8xf32>
    %42 = vector.extract_strided_slice %6 {offsets = [0, 48], sizes = [8, 8], strides = [1, 1]} : vector<8x96xf32> to vector<8x8xf32>
    %43 = vector.extract_strided_slice %6 {offsets = [0, 80], sizes = [8, 8], strides = [1, 1]} : vector<8x96xf32> to vector<8x8xf32>
    %cst_21 = arith.constant dense<0.000000e+00> : vector<8x8xf32>
    %44 = tpu.matmul %41, %42, %cst_21 {dimension_numbers = #tpu.dot_dimension_numbers<[1], [1], [0], [0], [0, 0, 1, 0], [], []>} : vector<8x8xf32>, vector<8x8xf32>, vector<8x8xf32> -> vector<8x8xf32>
    %cst_22 = arith.constant dense<0xFF800000> : vector<8xf32>
    %45 = vector.multi_reduction <maximumf>, %44, %cst_22 [1] : vector<8x8xf32> to vector<8xf32>
    %46 = vector.shape_cast %45 : vector<8xf32> to vector<8x1xf32>
    %47 = vector.broadcast %46 : vector<8x1xf32> to vector<8x8xf32>
    %48 = arith.subf %44, %47 : vector<8x8xf32>
    %49 = math.exp %48 : vector<8x8xf32>
    %cst_23 = arith.constant dense<0.000000e+00> : vector<8xf32>
    %50 = vector.multi_reduction <add>, %49, %cst_23 [1] : vector<8x8xf32> to vector<8xf32>
    %51 = vector.shape_cast %50 : vector<8xf32> to vector<8x1xf32>
    %52 = vector.broadcast %51 : vector<8x1xf32> to vector<8x8xf32>
    %53 = arith.divf %49, %52 : vector<8x8xf32>
    %c0_24 = arith.constant 0 : index
    %c2 = arith.constant 2 : index
    %c0_25 = arith.constant 0 : index
    %c0_26 = arith.constant 0 : index
    %54 = vector.load %arg7[%c0_24, %c2, %c0_25, %c0_26] : memref<1x4x8x8xf32, #tpu.memory_space<vmem>>, vector<1x1x8x8xf32>
    %55 = vector.shape_cast %54 : vector<1x1x8x8xf32> to vector<8x8xf32>
    %56 = vector.shape_cast %53 : vector<8x8xf32> to vector<1x1x8x8xf32>
    tpu.vector_store %arg7[%c0_24, %c2, %c0_25, %c0_26], %56 {strides = array<i32>} : memref<1x4x8x8xf32, #tpu.memory_space<vmem>>, vector<1x1x8x8xf32>,
    %cst_27 = arith.constant dense<0.000000e+00> : vector<8x8xf32>
    %57 = tpu.matmul %53, %43, %cst_27 {dimension_numbers = #tpu.dot_dimension_numbers<[1], [0], [0], [1], [0, 0, 1, 1], [], []>} : vector<8x8xf32>, vector<8x8xf32>, vector<8x8xf32> -> vector<8x8xf32>
    %58 = vector.extract_strided_slice %6 {offsets = [0, 24], sizes = [8, 8], strides = [1, 1]} : vector<8x96xf32> to vector<8x8xf32>
    %59 = vector.extract_strided_slice %6 {offsets = [0, 56], sizes = [8, 8], strides = [1, 1]} : vector<8x96xf32> to vector<8x8xf32>
    %60 = vector.extract_strided_slice %6 {offsets = [0, 88], sizes = [8, 8], strides = [1, 1]} : vector<8x96xf32> to vector<8x8xf32>
    %cst_28 = arith.constant dense<0.000000e+00> : vector<8x8xf32>
    %61 = tpu.matmul %58, %59, %cst_28 {dimension_numbers = #tpu.dot_dimension_numbers<[1], [1], [0], [0], [0, 0, 1, 0], [], []>} : vector<8x8xf32>, vector<8x8xf32>, vector<8x8xf32> -> vector<8x8xf32>
    %cst_29 = arith.constant dense<0xFF800000> : vector<8xf32>
    %62 = vector.multi_reduction <maximumf>, %61, %cst_29 [1] : vector<8x8xf32> to vector<8xf32>
    %63 = vector.shape_cast %62 : vector<8xf32> to vector<8x1xf32>
    %64 = vector.broadcast %63 : vector<8x1xf32> to vector<8x8xf32>
    %65 = arith.subf %61, %64 : vector<8x8xf32>
    %66 = math.exp %65 : vector<8x8xf32>
    %cst_30 = arith.constant dense<0.000000e+00> : vector<8xf32>
    %67 = vector.multi_reduction <add>, %66, %cst_30 [1] : vector<8x8xf32> to vector<8xf32>
    %68 = vector.shape_cast %67 : vector<8xf32> to vector<8x1xf32>
    %69 = vector.broadcast %68 : vector<8x1xf32> to vector<8x8xf32>
    %70 = arith.divf %66, %69 : vector<8x8xf32>
    %c0_31 = arith.constant 0 : index
    %c3 = arith.constant 3 : index
    %c0_32 = arith.constant 0 : index
    %c0_33 = arith.constant 0 : index
    %71 = vector.load %arg7[%c0_31, %c3, %c0_32, %c0_33] : memref<1x4x8x8xf32, #tpu.memory_space<vmem>>, vector<1x1x8x8xf32>
    %72 = vector.shape_cast %71 : vector<1x1x8x8xf32> to vector<8x8xf32>
    %73 = vector.shape_cast %70 : vector<8x8xf32> to vector<1x1x8x8xf32>
    tpu.vector_store %arg7[%c0_31, %c3, %c0_32, %c0_33], %73 {strides = array<i32>} : memref<1x4x8x8xf32, #tpu.memory_space<vmem>>, vector<1x1x8x8xf32>,
    %cst_34 = arith.constant dense<0.000000e+00> : vector<8x8xf32>
    %74 = tpu.matmul %70, %60, %cst_34 {dimension_numbers = #tpu.dot_dimension_numbers<[1], [0], [0], [1], [0, 0, 1, 1], [], []>} : vector<8x8xf32>, vector<8x8xf32>, vector<8x8xf32> -> vector<8x8xf32>
    %75 = tpu.concatenate %23, %40, %57, %74 in 1 : vector<8x8xf32>, vector<8x8xf32>, vector<8x8xf32>, vector<8x8xf32> -> vector<8x32xf32>
    %c0_35 = arith.constant 0 : index
    %c0_36 = arith.constant 0 : index
    %76 = vector.load %arg4[%c0_35, %c0_36] : memref<32x32xf32, #tpu.memory_space<vmem>>, vector<32x32xf32>
    %cst_37 = arith.constant dense<0.000000e+00> : vector<8x32xf32>
    %77 = tpu.matmul %75, %76, %cst_37 {dimension_numbers = #tpu.dot_dimension_numbers<[1], [0], [0], [1], [0, 0, 1, 1], [], []>} : vector<8x32xf32>, vector<32x32xf32>, vector<8x32xf32> -> vector<8x32xf32>
    %c0_38 = arith.constant 0 : index
    %c0_39 = arith.constant 0 : index
    %78 = vector.load %arg5[%c0_38, %c0_39] : memref<1x32xf32, #tpu.memory_space<vmem>>, vector<1x32xf32>
    %79 = vector.broadcast %78 : vector<1x32xf32> to vector<8x32xf32>
    %80 = arith.addf %77, %79 : vector<8x32xf32>
    %c0_40 = arith.constant 0 : index
    %c0_41 = arith.constant 0 : index
    %c0_42 = arith.constant 0 : index
    %81 = vector.load %arg6[%c0_40, %c0_41, %c0_42] : memref<1x8x32xf32, #tpu.memory_space<vmem>>, vector<1x8x32xf32>
    %82 = vector.shape_cast %81 : vector<1x8x32xf32> to vector<8x32xf32>
    %83 = vector.shape_cast %80 : vector<8x32xf32> to vector<1x8x32xf32>
    tpu.vector_store %arg6[%c0_40, %c0_41, %c0_42], %83 {strides = array<i32>} : memref<1x8x32xf32, #tpu.memory_space<vmem>>, vector<1x8x32xf32>,
    return
  }
  func.func @transform_0(%arg0: i32) -> (i32, i32, i32) {
    %c0_i32 = arith.constant 0 : i32
    %c0_i32_0 = arith.constant 0 : i32
    %c0_i32_1 = arith.constant 0 : i32
    return %arg0, %c0_i32, %c0_i32_0 : i32, i32, i32
  }
  func.func @transform_1(%arg0: i32) -> (i32, i32) {
    %c0_i32 = arith.constant 0 : i32
    %c0_i32_0 = arith.constant 0 : i32
    %c0_i32_1 = arith.constant 0 : i32
    return %c0_i32, %c0_i32_0 : i32, i32
  }
  func.func @transform_2(%arg0: i32) -> (i32, i32) {
    %c0_i32 = arith.constant 0 : i32
    %c0_i32_0 = arith.constant 0 : i32
    %c0_i32_1 = arith.constant 0 : i32
    return %c0_i32, %c0_i32_0 : i32, i32
  }
  func.func @transform_3(%arg0: i32) -> (i32, i32) {
    %c0_i32 = arith.constant 0 : i32
    %c0_i32_0 = arith.constant 0 : i32
    %c0_i32_1 = arith.constant 0 : i32
    return %c0_i32, %c0_i32_0 : i32, i32
  }
  func.func @transform_4(%arg0: i32) -> (i32, i32) {
    %c0_i32 = arith.constant 0 : i32
    %c0_i32_0 = arith.constant 0 : i32
    %c0_i32_1 = arith.constant 0 : i32
    return %c0_i32, %c0_i32_0 : i32, i32
  }
  func.func @transform_5(%arg0: i32) -> (i32, i32, i32) {
    %c0_i32 = arith.constant 0 : i32
    %c0_i32_0 = arith.constant 0 : i32
    %c0_i32_1 = arith.constant 0 : i32
    return %arg0, %c0_i32, %c0_i32_0 : i32, i32, i32
  }
  func.func @transform_6(%arg0: i32) -> (i32, i32, i32, i32) {
    %c0_i32 = arith.constant 0 : i32
    %c0_i32_0 = arith.constant 0 : i32
    %c0_i32_1 = arith.constant 0 : i32
    %c0_i32_2 = arith.constant 0 : i32
    return %arg0, %c0_i32, %c0_i32_0, %c0_i32_1 : i32, i32, i32, i32
  }
}

</mosaic_0001>

<bundles_post_ra>
// kernel: tpu_custom_call.1
= control target key start
LH: loop header
LB: loop body
LE: loop exit
PB: predicated region body
PF: predicated region fallthrough
CT: control target
= control target key end

     0   :  { %s1501_s0 = inlined_call_operand.hbm [shape: f32[2,8,32], index: 0, kind: input, shape index: {}]   ;;  %s1502_s1 = inlined_call_operand.hbm [shape: f32[32,96], index: 1, kind: input, shape index: {}]   ;;  %s1503_s2 = inlined_call_operand.vmem [shape: f32[1,96], index: 2, kind: input, shape index: {}]   ;;  %s1504_s3 = inlined_call_operand.hbm [shape: f32[32,32], index: 3, kind: input, shape index: {}]   ;;  %s1505_s4 = inlined_call_operand.vmem [shape: f32[1,32], index: 4, kind: input, shape index: {}]   ;;  %s1506_s5 = inlined_call_operand.hbm [shape: f32[2,8,32], index: 5, kind: output, shape index: {0}]   ;;  %s1507_s6 = inlined_call_operand.hbm [shape: f32[2,4,8,8], index: 6, kind: output, shape index: {1}]  }
   0x1   :  { %1509 = sst [smem:[#allocation15_spill]] %s1502_s1 }
   0x2   :  { %12 = vsyncpa [#allocation3], 0 }
   0x3   :  { %14 = vsyncpa [#allocation3 + $0x1], 0 }
   0x4   :  { %15 = vsyncpa [#allocation6], 0 }
   0x5   :  { %16 = vsyncpa [#allocation4], 0 }
   0x6   :  { %18 = vsyncpa [#allocation4 + $0x1], 0 }
   0x7   :  { %19 = vsyncpa [#allocation10], 0 }
   0x8   :  { %21 = vsyncpa [#allocation10 + $0x1], 0  ;;  %s1267_s21 = smov 0   ;;  %s1269_s22 = smov 0  }
   0x9   :  { %s1271_s23 = smov 0   ;;  %s1273_s24 = smov 0  }
   0xa LB: > { %s1510_s1 = sld [smem:[#allocation15_spill]]  ;;  %s1291_s28 = sadd.s32 4294967295, %s1211_s24   ;;  %s1211_s24 = sphi %s1273_s24, %s1522_s24   ;;  %s1207_s23 = sphi %s1271_s23, %s1521_s23   ;;  %s1203_s22 = sphi %s1269_s22, %s1520_s22   ;;  %s1199_s21 = sphi %s1267_s21, %s1519_s21  }
   0xb   : > { %p875_p0 = scmp.ge.s32.totalorder %s1211_s24, 1  ;;  %p48_p1 = scmp.eq.s32.totalorder %s1291_s28, 0 }
   0xc   : > { %p194_p2 = scmp.lt.s32.totalorder %s1211_s24, 3  ;;  %s1213_s30 = smov [#allocation5]  }
   0xd   : > { %s207_s7 = sshll.u32 %s1213_s30, 4  ;;  %s222_s10 = sshll.u32 %s1504_s3, 4  ;;  %s208_s7 = int_to_ptr.vmem [resolvable:$true] %s207_s7  ;;  %s223_s10 = int_to_ptr.hbm [resolvable:$true] %s222_s10 }
   0xe   : > { %p1296_p3 = pnand %p875_p0, %p194_p2  ;;  %s1214_s11 = smov [#allocation7]  }
   0xf   : > { %s224_s12 = sshll.u32 %s1214_s11, 4  ;;  %s1215_s13 = smov 128   ;;  %s225_s12 = int_to_ptr.vmem [resolvable:$true] %s224_s12 }
  0x10   : > { %s205_s27 = sshll.u32 %s1510_s1, 4  ;;  %p926_p4 = pneg %p1296_p3  ;;  %s206_s27 = int_to_ptr.hbm [resolvable:$true] %s205_s27 }
  0x11   : > { %s1216_s14 = smov 8   ;;  %s874_s15 = sadd.s32 4294967294, %s1211_s24  }
  0x12   : > { %p927_p6 = pnand %p926_p4, %p48_p1  ;;  %s1310_s16 = sadd.s32 1, %s1211_s24  }
  0x13   : > { %s31_s17 = ssub.s32 %s1211_s24, %s1310_s16  ;;  %s34_s18 = sadd.s32 1, %s1207_s23 }
  0x14   : > { %929 = dma.hbm_to_vmem [thread:$0]  (!%p927_p6), %s206_s27, 512, %s208_s7, [#allocation6], %s1215_s13, %s1215_s13, %s1216_s14  }
  0x15   : > { %932 = dma.hbm_to_vmem [thread:$0]  (!%p927_p6), %s223_s10, 512, %s225_s12, [#allocation6], %s1215_s13, %s1215_s13, %s1216_s14  }
  0x16   : > { %p32_p7 = scmp.eq.s32.totalorder %s31_s17, 0  ;;  %p41_p8 = scmp.ne.s32.totalorder %s1207_s23, %s1203_s22 }
  0x17   : > { %p42_p9 = scmp.eq.s32.totalorder %s1211_s24, 0  ;;  %p47_p10 = scmp.ne.s32.totalorder %s1203_s22, %s1199_s21 }
  0x18   : > { %s1321_s19 = scalar_select %p32_p7, %s1207_s23, %s34_s18  }
  0x19   : > { %p1323_p11 = por %p42_p9, %p41_p8  ;;  %p1329_p12 = por %p48_p1, %p47_p10 }
  0x1a   : > { %p155_p13 = scmp.eq.s32.totalorder %s1291_s28, 1  ;;  %p161_p0 = scmp.eq.s32.totalorder %s874_s15, 1 }
  0x1b   : > { %p946_p2 = scmp.lt.s32.totalorder %s1211_s24, 2  ;;  %s241_s26 = sand.u32 1, %s1207_s23  }
  0x1c   : > { %p1336_p4 = por %p155_p13, %p41_p8  ;;  %p1340_p6 = por %p161_p0, %p47_p10 }
  0x1d   : > { %s879_s7 = sshll.u32 %s241_s26, 3  ;;  %s880_s8 = sshll.u32 %s1211_s24, 3 }
  0x1e   : > { %s249_s11 = scalar_lea.hbm %s1501_s0, %s880_s8  ;;  %s245_s12 = scalar_lea.vmem [#allocation2], %s879_s7 }
  0x1f   : > { %s253_s13 = sshll.u32 %s245_s12, 4  ;;  %s251_s14 = sshll.u32 %s249_s11, 4  ;;  %s254_s13 = int_to_ptr.vmem [resolvable:$true] %s253_s13  ;;  %s252_s14 = int_to_ptr.hbm [resolvable:$true] %s251_s14 }
  0x20   : > { %p1350_p7 = pnand %p946_p2, %p1323_p11  ;;  %s242_s17 = scalar_lea.sflag [#allocation3], %s241_s26 }
  0x21   : > { %s1079_s18 = sshra.s32 %s252_s14, 4  ;;  %s1086_s9 = scalar_lea.hbm %s1501_s0, 16  ;;  %s1080_s18 = int_to_ptr.hbm [resolvable:$true] %s1079_s18 }
  0x22   : > { %s1081_s1 = scalar_lea.hbm %s1080_s18, 8  ;;  %p1083_p9 = pneg %p1350_p7 }
  0x23   : > { %p1082_p8 = scmp.ne.s32.totalorder %s1080_s18, %s1081_s1  ;;  %p1087_p11 = scmp.lt.s32.totalorder %s1080_s18, %s1501_s0 }
  0x24   : > { %p1088_p0 = scmp.lt.s32.totalorder %s1086_s9, %s1081_s1 }
  0x25   : > { %p1084_p10 = pnand %p1083_p9, %p1082_p8 }
  0x26   : > { %p1089_p2 = por %p1088_p0, %p1087_p11 }
  0x27   : > { %p1085_p13 = pneg %p1084_p10 }
  0x29   : > { %p1090_p5 = pnand %p1089_p2, %p1085_p13 }
  0x2b   : > { %1093 = shalt.err (!%p1090_p5)
}
  0x2c   : > { %936 = dma.hbm_to_vmem [thread:$0]  (!%p1350_p7), %s252_s14, 128, %s254_s13, %s242_s17  }
  0x2d   : > { %262 = sbr.rel (%p1296_p3) target bundleno = 1106 (0x452), region = 40  ;;  %s1367_s26 = sand.u32 (!%p1296_p3), 1, %s1203_s22  }
  0x2e   : > { %s1508_s11 = sshll.u32 (!%p1296_p3), %s1367_s26, 3  ;;  %s265_s12 = scalar_lea.sflag (!%p1296_p3), [#allocation3], %s1367_s26 }
  0x2f   : > { %s268_s1 = scalar_lea.vmem (!%p1296_p3), [#allocation2], %s1508_s11 }
  0x32   : > { %1182 = dma.done.wait (%p1329_p12), %s265_s12, 128  }
  0x33   : > { %1184 = vsyncadd (%p1329_p12), %s265_s12, 4294967168 }
  0x34   : > { %1186 = dma.done.wait (%p48_p1), [#allocation6], 1024  }
  0x35   : > { %1188 = vsyncadd (%p48_p1), [#allocation6], 4294966272  ;;  %v317_v0 = vld [vmem:[#allocation5 + $0x18] sm:$0xff]  ;;  %v316_v1 = vld [vmem:[#allocation5 + $0x10] sm:$0xff]  ;;  %vm322_vm0 = vcmask 261120   ;;  %s1217_s13 = smov 72  }
  0x36   : > { %338 = vmatpush.msra.mxu0 %v317_v0  ;;  %v315_v2 = vld [vmem:[#allocation5 + $0x8] sm:$0xff]  ;;  %v314_v3 = vld [vmem:[#allocation5] sm:$0xff]  ;;  %v313_v4 = vld [vmem:[%s268_s1] sm:$0xff]  ;;  %s1218_s14 = smov 120   ;;  %s1219_s15 = smov 96   ;;  %vm349_vm1 = vcmask 64512  }
  0x37   : > { %v1001_v5 = vld [vmem:[%s1503_s2] ss:$0 sm:$0xff]  ;;  %s1220_s17 = smov 112   ;;  %s1221_s18 = smov 80  }
  0x38   : > { %339 = vmatpush.msra.mxu0 %v316_v1  ;;  %s1222_s7 = smov 88   ;;  %s1223_s8 = smov 104  }
  0x39   : > { %s1224_s9 = smov 56   ;;  %s1225_s10 = smov 40  }
  0x3a   : > { %340 = vmatpush.msra.mxu0 %v315_v2  ;;  %s1226_s20 = smov 64   ;;  %s1227_s12 = smov 48  }
  0x3b   : > { %s886_s1 = sshll.u32 %s1367_s26, 5  ;;  %s1228_s25 = smov 8  }
  0x3c   : > { %341 = vmatpush.msra.mxu0 %v314_v3  ;;  %s1425_s29 = scalar_lea.vmem [#allocation9], %s886_s1 }
  0x3d   : > { %887 = vmatmul.msk.f32.vlgmr.msra.gmra.mxu0 %vm322_vm0, %v313_v4 }
  0xba   : > { %v343_v6 = vpop.f32.mrf.mxu0 }
  0xbb   : > { %v1385_v7 = vadd.f32 %v1001_v5, %v343_v6 }
  0xbd   : > { %587 = vrot.lane.b32.xlu2 %v1385_v7, %s1217_s13  ;;  %425 = vrot.lane.b32.xlu1 %v1385_v7, %s1218_s14  ;;  %s1229_s13 = smov 24   ;;  %s1230_s14 = smov 16  }
  0xbe   : > { %347 = vrot.lane.b32.xlu0 %v1385_v7, %s1219_s15  ;;  %s746_s15 = sshll.u32 %s1425_s29, 4  ;;  %s747_s15 = int_to_ptr.vmem [resolvable:$true] %s746_s15 }
  0xc5   : > { %505 = vrot.lane.b32.xlu2 %v1385_v7, %s1220_s17  ;;  %507 = vrot.lane.b32.xlu1 %v1385_v7, %s1221_s18  ;;  %s911_s17 = sshll.u32 %s1291_s28, 5 }
  0xc6   : > { %427 = vrot.lane.b32.xlu0 %v1385_v7, %s1222_s7 }
  0xce   : > { %585 = vrot.lane.b32.xlu0 %v1385_v7, %s1223_s8  ;;  %s745_s8 = scalar_lea.hbm %s1507_s6, %s911_s17 }
 0x117   : > { %v588_v8 = vpop.permute.xlu2 %587 }
 0x118   : > { %899 = vmatpush.xpose.msk.msrb.mxu0 %vm349_vm1, %v588_v8 }
 0x11f   : > { %v506_v13 = vpop.permute.xlu2 %505 }
 0x12f   : > { %v426_v9 = vpop.permute.xlu1 %425 }
 0x130   : > { %v348_v10 = vpop.permute.xlu0 %347 }
 0x131   : > { %888 = vmatpush.xpose.msk.msra.mxu1 %vm349_vm1, %v348_v10 }
 0x134   : > { %889 = vmatmul.msk.f32.vlgmr.msra.gmra.mxu1 %vm349_vm1, %v1385_v7 }
 0x137   : > { %v508_v11 = vpop.permute.xlu1 %507 }
 0x138   : > { %v428_v12 = vpop.permute.xlu0 %427  ;;  %895 = vmatpush.xpose.msk.msrb.mxu1 %vm349_vm1, %v508_v11 }
 0x139   : > { %891 = vmatpush.xpose.msk.msra.mxu3 %vm349_vm1, %v428_v12 }
 0x13c   : > { %892 = vmatmul.msk.f32.vlgmr.msra.gmra.mxu3 %vm349_vm1, %v426_v9  ;;  %896 = vmatmul.msk.f32.vlgmr.msrb.gmra.mxu1 %vm349_vm1, %v506_v13 }
 0x140   : > { %v586_v14 = vpop.permute.xlu0 %585 }
 0x141   : > { %900 = vmatmul.msk.f32.vlgmr.msrb.gmra.mxu0 %vm349_vm1, %v586_v14 }
 0x1b1   : > { %v371_v15 = vpop.f32.mrf.mxu1 }
 0x1b2   : > { %v374_v16 = vsel %vm349_vm1, %v371_v15, -inf }
 0x1b3   : > { %375 = vmax.xlane.f32.xlu1 %v374_v16 }
 0x1b9   : > { %v530_v17 = vpop.f32.mrf.mxu1 }
 0x1ba   : > { %v533_v18 = vsel %vm349_vm1, %v530_v17, -inf }
 0x1bb   : > { %534 = vmax.xlane.f32.xlu0 %v533_v18 }
 0x1be   : > { %v610_v21 = vpop.f32.mrf.mxu0 }
 0x1bf   : > { %v450_v19 = vpop.f32.mrf.mxu3  ;;  %v613_v22 = vsel %vm349_vm1, %v610_v21, -inf }
 0x1c0   : > { %v453_v20 = vsel %vm349_vm1, %v450_v19, -inf }
 0x1c1   : > { %454 = vmax.xlane.f32.xlu2 %v453_v20 }
 0x1c9   : > { %614 = vmax.xlane.f32.xlu2 %v613_v22 }
 0x1cf   : > { %479 = vrot.lane.b32.xlu0 %v1385_v7, %s1224_s9  ;;  %s748_s9 = sshll.u32 %s745_s8, 4  ;;  %s749_s9 = int_to_ptr.hbm [resolvable:$true] %s748_s9 }
 0x226   : > { %v376_v23 = vpop.xlane.xlu1 %375 }
 0x227   : > { %v377_v24 = vsub.f32 %v371_v15, %v376_v23 }
 0x229   : > { %v378_v25 = vmul.f32 1.442695, %v377_v24 }
 0x22b   : > { %1003 = vpow2.f32 %v378_v25 }
 0x22e   : > { %v535_v26 = vpop.xlane.xlu0 %534 }
 0x22f   : > { %v536_v27 = vsub.f32 %v530_v17, %v535_v26 }
 0x231   : > { %v1004_v28 = vpop.eup %1003  ;;  %v537_v29 = vmul.f32 1.442695, %v536_v27 }
 0x232   : > { %v380_v30 = vsel %vm349_vm1, %v1004_v28, 0.0 }
 0x233   : > { %1005 = vpow2.f32 %v537_v29  ;;  %381 = vadd.xlane.f32.xlu1 %v380_v30 }
 0x234   : > { %v455_v31 = vpop.xlane.xlu2 %454 }
 0x235   : > { %v456_v32 = vsub.f32 %v450_v19, %v455_v31 }
 0x237   : > { %v457_v33 = vmul.f32 1.442695, %v456_v32 }
 0x239   : > { %v1409_v34 = vpop.eup %1005  ;;  %1007 = vpow2.f32 %v457_v33 }
 0x23a   : > { %v539_v35 = vsel %vm349_vm1, %v1409_v34, 0.0 }
 0x23b   : > { %540 = vadd.xlane.f32.xlu0 %v539_v35  ;;  %v685_v35 = vld [vmem:[#allocation7 + $0x18] sm:$0xff] }
 0x23c   : > { %v615_v36 = vpop.xlane.xlu2 %614  ;;  %705 = vmatpush.msra.mxu1 %v685_v35 }
 0x23d   : > { %v616_v37 = vsub.f32 %v610_v21, %v615_v36  ;;  %v684_v36 = vld [vmem:[#allocation7 + $0x10] sm:$0xff] }
 0x23e   : > { %706 = vmatpush.msra.mxu1 %v684_v36 }
 0x23f   : > { %v1413_v38 = vpop.eup %1007  ;;  %v617_v39 = vmul.f32 1.442695, %v616_v37  ;;  %v683_v37 = vld [vmem:[#allocation7 + $0x8] sm:$0xff] }
 0x240   : > { %v459_v40 = vsel %vm349_vm1, %v1413_v38, 0.0  ;;  %707 = vmatpush.msra.mxu1 %v683_v37 }
 0x241   : > { %1009 = vpow2.f32 %v617_v39  ;;  %460 = vadd.xlane.f32.xlu2 %v459_v40  ;;  %v480_v43 = vpop.permute.xlu0 %479 }
 0x247   : > { %v1417_v41 = vpop.eup %1009 }
 0x248   : > { %v619_v42 = vsel %vm349_vm1, %v1417_v41, 0.0 }
 0x249   : > { %620 = vadd.xlane.f32.xlu1 %v619_v42 }
 0x24f   : > { %639 = vrot.lane.b32.xlu0 %v1385_v7, %s1225_s10  ;;  %s720_s10 = scalar_lea.sflag [#allocation10], %s1367_s26 }
 0x259   : > { %399 = vrot.lane.b32.xlu2 %v1385_v7, %s1226_s20  ;;  %s1123_s20 = sshra.s32 %s749_s9, 4  ;;  %s1124_s20 = int_to_ptr.hbm [resolvable:$true] %s1123_s20 }
 0x25a   : > { %p1130_p12 = scmp.lt.s32.totalorder %s1124_s20, %s1507_s6 }
 0x262   : > { %559 = vrot.lane.b32.xlu1 %v1385_v7, %s1227_s12  ;;  %s1125_s12 = scalar_lea.hbm %s1124_s20, 32 }
 0x263   : > { %p1126_p1 = scmp.ne.s32.totalorder %s1124_s20, %s1125_s12 }
 0x265   : > { %p1127_p3 = pnand %p1126_p1, %p1336_p4 }
 0x267   : > { %p1128_p5 = pneg %p1127_p3 }
 0x2a6   : > { %v382_v44 = vpop.xlane.xlu1 %381 }
 0x2a7   : > { %1011 = vrcp.f32 %v382_v44  ;;  %v394_v49 = vand.u32 2147483648, %v382_v44  ;;  %v392_v51 = vand.u32 2147483647, %v382_v44  ;;  %vm388_vm3 = vweird.f32 %v382_v44 }
 0x2a9   : > { %v395_v55 = vor.u32 1.1754944e-38, %v394_v49  ;;  %vm393_vm5 = vcmp.eq.f32.partialorder %v392_v51, 8.507059e+37 }
 0x2ad   : > { %v1012_v45 = vpop.eup %1011 }
 0x2ae   : > { %v384_v46 = vmul.f32 %v1012_v45, %v382_v44  ;;  %v541_v47 = vpop.xlane.xlu0 %540  ;;  %vm389_vm2 = vweird.f32 %v1012_v45 }
 0x2af   : > { %1013 = vrcp.f32 %v541_v47  ;;  %vm390_vm4 = vmor %vm388_vm3, %vm389_vm2  ;;  %v553_v61 = vand.u32 2147483648, %v541_v47  ;;  %v551_v63 = vand.u32 2147483647, %v541_v47  ;;  %vm547_vm7 = vweird.f32 %v541_v47 }
 0x2b0   : > { %v385_v48 = vsub.f32 1.0, %v384_v46 }
 0x2b1   : > { %v554_v5 = vor.u32 1.1754944e-38, %v553_v61  ;;  %vm552_vm9 = vcmp.eq.f32.partialorder %v551_v63, 8.507059e+37 }
 0x2b2   : > { %v386_v50 = vmul.f32 %v1012_v45, %v385_v48 }
 0x2b4   : > { %v461_v52 = vpop.xlane.xlu2 %460  ;;  %v387_v53 = vadd.f32 %v1012_v45, %v386_v50 }
 0x2b5   : > { %v1014_v54 = vpop.eup %1013  ;;  %1015 = vrcp.f32 %v461_v52  ;;  %v473_v8 = vand.u32 2147483648, %v461_v52  ;;  %v471_v11 = vand.u32 2147483647, %v461_v52  ;;  %vm467_vm11 = vweird.f32 %v461_v52 }
 0x2b6   : > { %v543_v56 = vmul.f32 %v1014_v54, %v541_v47  ;;  %v391_v57 = vsel %vm390_vm4, %v1012_v45, %v387_v53  ;;  %vm548_vm6 = vweird.f32 %v1014_v54  ;;  %vm678_vm4 = vcmask 130048  }
 0x2b7   : > { %v396_v58 = vsel %vm393_vm5, %v395_v55, %v391_v57  ;;  %vm549_vm8 = vmor %vm547_vm7, %vm548_vm6  ;;  %v474_v16 = vor.u32 1.1754944e-38, %v473_v8  ;;  %vm472_vm13 = vcmp.eq.f32.partialorder %v471_v11, 8.507059e+37  ;;  %vm680_vm5 = vcmask 195584  }
 0x2b8   : > { %v544_v59 = vsub.f32 1.0, %v543_v56  ;;  %v397_v60 = vmul.f32 %v1004_v28, %v396_v58 }
 0x2ba   : > { %v545_v62 = vmul.f32 %v1014_v54, %v544_v59  ;;  %398 = vst.msk [vmem:[%s1425_s29] sm:$0xff] %vm349_vm1, %v397_v60 }
 0x2bb   : > { %v1016_v0 = vpop.eup %1015 }
 0x2bc   : > { %v546_v1 = vadd.f32 %v1014_v54, %v545_v62  ;;  %v463_v2 = vmul.f32 %v1016_v0, %v461_v52  ;;  %v621_v3 = vpop.xlane.xlu1 %620  ;;  %v400_v4 = vpop.permute.xlu2 %399  ;;  %vm468_vm10 = vweird.f32 %v1016_v0 }
 0x2bd   : > { %1017 = vrcp.f32 %v621_v3  ;;  %420 = vmatpush.msra.mxu2 %v400_v4  ;;  %vm469_vm12 = vmor %vm467_vm11, %vm468_vm10  ;;  %v633_v22 = vand.u32 2147483648, %v621_v3  ;;  %v631_v24 = vand.u32 2147483647, %v621_v3  ;;  %vm627_vm15 = vweird.f32 %v621_v3 }
 0x2be   : > { %v464_v6 = vsub.f32 1.0, %v463_v2  ;;  %890 = vmatmul.msk.f32.vlgmr.msra.gmra.mxu2 %vm349_vm1, %v397_v60  ;;  %v550_v7 = vsel %vm549_vm8, %v1014_v54, %v546_v1 }
 0x2bf   : > { %500 = vmatpush.msrb.mxu2 %v480_v43  ;;  %v555_v9 = vsel %vm552_vm9, %v554_v5, %v550_v7  ;;  %v634_v26 = vor.u32 1.1754944e-38, %v633_v22  ;;  %vm632_vm3 = vcmp.eq.f32.partialorder %v631_v24, 8.507059e+37 }
 0x2c0   : > { %v465_v10 = vmul.f32 %v1016_v0, %v464_v6  ;;  %v556_v12 = vmul.f32 %v1409_v34, %v555_v9 }
 0x2c1   : > { %v640_v13 = vpop.permute.xlu0 %639 }
 0x2c2   : > { %v466_v14 = vadd.f32 %v1016_v0, %v465_v10  ;;  %660 = vmatpush.msra.mxu2 %v640_v13  ;;  %897 = vst.msk [vmem:[%s1425_s29 + $0x10] sm:$0xff] %vm349_vm1, %v556_v12 }
 0x2c3   : > { %v1018_v15 = vpop.eup %1017 }
 0x2c4   : > { %v623_v17 = vmul.f32 %v1018_v15, %v621_v3  ;;  %v470_v18 = vsel %vm469_vm12, %v1016_v0, %v466_v14  ;;  %vm628_vm14 = vweird.f32 %v1018_v15 }
 0x2c5   : > { %v475_v19 = vsel %vm472_vm13, %v474_v16, %v470_v18  ;;  %vm629_vm2 = vmor %vm627_vm15, %vm628_vm14 }
 0x2c6   : > { %v624_v20 = vsub.f32 1.0, %v623_v17  ;;  %v476_v21 = vmul.f32 %v1413_v38, %v475_v19  ;;  %v682_v38 = vld [vmem:[#allocation7] sm:$0xff] }
 0x2c7   : > { %708 = vmatpush.msra.mxu1 %v682_v38 }
 0x2c8   : > { %v625_v23 = vmul.f32 %v1018_v15, %v624_v20  ;;  %893 = vst.msk [vmem:[%s1425_s29 + $0x8] sm:$0xff] %vm349_vm1, %v476_v21  ;;  %894 = vmatmul.msk.f32.vlgmr.msrb.gmra.mxu2 %vm349_vm1, %v476_v21 }
 0x2ca   : > { %v626_v25 = vadd.f32 %v1018_v15, %v625_v23 }
 0x2cc   : > { %v630_v27 = vsel %vm629_vm2, %v1018_v15, %v626_v25 }
 0x2cd   : > { %v635_v28 = vsel %vm632_vm3, %v634_v26, %v630_v27 }
 0x2ce   : > { %v636_v29 = vmul.f32 %v1417_v41, %v635_v28 }
 0x2d0   : > { %901 = vst.msk [vmem:[%s1425_s29 + $0x18] sm:$0xff] %vm349_vm1, %v636_v29  ;;  %902 = vmatmul.msk.f32.vlgmr.msra.gmra.mxu2 %vm349_vm1, %v636_v29 }
 0x2d4   : > { %v560_v30 = vpop.permute.xlu1 %559 }
 0x2d5   : > { %580 = vmatpush.msrb.mxu3 %v560_v30 }
 0x2d6   : > { %898 = vmatmul.msk.f32.vlgmr.msrb.gmra.mxu3 %vm349_vm1, %v556_v12 }
 0x341   : > { %v422_v31 = vpop.f32.mrf.mxu2 }
 0x34b   : > { %v502_v32 = vpop.f32.mrf.mxu2 }
 0x34c   : > { %666 = vrot.lane.b32.xlu2 %v502_v32, %s1228_s25 }
 0x353   : > { %v662_v33 = vpop.f32.mrf.mxu2 }
 0x354   : > { %674 = vrot.lane.b32.xlu0 %v662_v33, %s1229_s13  ;;  %s1129_s13 = scalar_lea.hbm %s1507_s6, 64 }
 0x355   : > { %p1131_p7 = scmp.lt.s32.totalorder %s1129_s13, %s1125_s12 }
 0x357   : > { %p1132_p8 = por %p1131_p7, %p1130_p12 }
 0x359   : > { %v582_v34 = vpop.f32.mrf.mxu3  ;;  %p1133_p9 = pnand %p1132_p8, %p1128_p5 }
 0x35a   : > { %670 = vrot.lane.b32.xlu1 %v582_v34, %s1230_s14 }
 0x3a6   : > { %v667_v39 = vpop.permute.xlu2 %666 }
 0x3a7   : > { %v677_v40 = vsel %vm349_vm1, %v422_v31, %v667_v39 }
 0x3c6   : > { %v675_v42 = vpop.permute.xlu0 %674 }
 0x3cc   : > { %v671_v41 = vpop.permute.xlu1 %670 }
 0x3cd   : > { %v679_v43 = vsel %vm678_vm4, %v677_v40, %v671_v41 }
 0x3ce   : > { %v681_v44 = vsel %vm680_vm5, %v679_v43, %v675_v42 }
 0x3cf   : > { %903 = vmatmul.msk.f32.vlgmr.msra.gmra.mxu1 %vm322_vm0, %v681_v44 }
 0x3d0   : > { %1136 = shalt.err (!%p1133_p9)
}
 0x3d1   : > { %s1231_s17 = smov 128   ;;  %s906_s18 = sshll.u32 %s1291_s28, 3  ;;  %v1002_v45 = vld [vmem:[%s1505_s4] ss:$0 sm:$0xff] }
 0x3d2   : > { %923 = dma.vmem_to_hbm [thread:$0]  (%p1336_p4), %s747_s15, 512, %s749_s9, %s720_s10, %s1231_s17, %s1231_s17, %s1228_s25  }
 0x3d3   : > { %s730_s1 = scalar_lea.hbm %s1506_s5, %s906_s18  ;;  %s1517_s12 = sshll.u32 %s1367_s26, 3 }
 0x3d4   : > { %s305_s29 = scalar_lea.vmem [#allocation8], %s1517_s12  ;;  %s734_s14 = sshll.u32 %s730_s1, 4  ;;  %s735_s14 = int_to_ptr.hbm [resolvable:$true] %s734_s14 }
 0x3d5   : > { %s732_s13 = sshll.u32 %s305_s29, 4  ;;  %s715_s28 = scalar_lea.sflag [#allocation4], %s1367_s26  ;;  %s733_s13 = int_to_ptr.vmem [resolvable:$true] %s732_s13 }
 0x3d6   : > { %s1151_s25 = sshra.s32 %s735_s14, 4  ;;  %s1157_s17 = scalar_lea.hbm %s1506_s5, 16  ;;  %s1152_s25 = int_to_ptr.hbm [resolvable:$true] %s1151_s25 }
 0x3d7   : > { %s1153_s15 = scalar_lea.hbm %s1152_s25, 8  ;;  %p1158_p0 = scmp.lt.s32.totalorder %s1152_s25, %s1506_s5 }
 0x3d8   : > { %p1154_p10 = scmp.ne.s32.totalorder %s1152_s25, %s1153_s15  ;;  %p1159_p2 = scmp.lt.s32.totalorder %s1157_s17, %s1153_s15 }
 0x3da   : > { %p1155_p13 = pnand %p1154_p10, %p1336_p4  ;;  %p1160_p1 = por %p1159_p2, %p1158_p0 }
 0x3dc   : > { %p1156_p11 = pneg %p1155_p13 }
 0x3de   : > { %p1161_p3 = pnand %p1160_p1, %p1156_p11 }
 0x44c   : > { %v710_v46 = vpop.f32.mrf.mxu1 }
 0x44d   : > { %v711_v47 = vadd.f32 %v1002_v45, %v710_v46 }
 0x44f   : > { %713 = vst.msk [vmem:[%s305_s29] sm:$0xff] %vm322_vm0, %v711_v47 }
 0x450   : > { %1164 = shalt.err (!%p1161_p3)
}
 0x451   : > { %922 = dma.vmem_to_hbm [thread:$0]  (%p1336_p4), %s733_s13, 128, %s735_s14, %s715_s28  }
 0x452 PF: > { %s763_s26 = sand.u32 1, %s1199_s21   ;;  %p1518_p5 = scmp.ge.s32.totalorder %s1211_s24, 2 }
 0x453   : > { %s764_s8 = scalar_lea.sflag [#allocation4], %s763_s26 }
 0x454   : > { %p938_p12 = pnand %p1518_p5, %p1340_p6 }
 0x456   : > { %p939_p7 = pneg %p938_p12 }
 0x458   : > { %1190 = dma.done.wait (%p939_p7), %s764_s8, 128  }
 0x459   : > { %1192 = vsyncadd (%p939_p7), %s764_s8, 4294967168  ;;  %s774_s1 = scalar_lea.sflag [#allocation10], %s763_s26 }
 0x45a   : > { %1194 = dma.done.wait (%p939_p7), %s774_s1, 512  }
 0x45b   : > { %1196 = vsyncadd (%p939_p7), %s774_s1, 4294966784  ;;  %p24_p4 = scmp.ge.s32.totalorder %s1310_s16, 4   ;;  %s1519_s21 = smov %s1203_s22 }
 0x45c   : > { %s1520_s22 = smov %s1207_s23  ;;  %s1521_s23 = smov %s1321_s19 }
 0x45d   : > { %s1522_s24 = smov %s1310_s16  ;;  %26 = sbr.rel (!%p24_p4) target bundleno = 10 (0xa), region = 113 }
 0x462   :  { %780 = vsyncpa [#allocation3], 1 }
 0x463   :  { %782 = vsyncpa [#allocation3 + $0x1], 1 }
 0x464   :  { %783 = vsyncpa [#allocation6], 1 }
 0x465   :  { %784 = vsyncpa [#allocation4], 1 }
 0x466   :  { %786 = vsyncpa [#allocation4 + $0x1], 1 }
 0x467   :  { %787 = vsyncpa [#allocation10], 1 }
 0x468   :  { %789 = vsyncpa [#allocation10 + $0x1], 1 }

</bundles_post_ra>
